<compile_context>
chip_gen: v7x
topology: tpu7x:2x2x1
jax: 0.10.0
libtpu: 0.0.40
codegen_flags: <defaults>
</compile_context>

<pallas_src>
import jax
import jax.numpy as jnp
from jax.experimental import pallas as pl
from jax.experimental.pallas import tpu as pltpu


def coupled_ode_kernel(xf_ref, xt_ref, adj_ref, wn_ref, slab_ref, sp_ref,
                       gate_ref, be_ref, out_ref):
    TM, D = out_ref.shape

    x_full = xf_ref[...]                                              # [N, D] (resident)
    x_tile = xt_ref[...]                                              # [TM, D]

    # packed small params: row 0 = w_dst, row 1 = b_n
    w_dst = sp_ref[0:1, :]                                            # [1, D]
    b_n   = sp_ref[1:2, :]                                            # [1, D]
    b_e   = be_ref[0, 0]                                              # scalar (SMEM)

    # message transform for ALL nodes (needed by this tile's rows of E @ msg);
    # recomputed per tile -- only ~D/TM extra MXU vs. the big matmul below.
    msg = jnp.dot(x_full, wn_ref[...], preferred_element_type=jnp.float32)      # [N, D]

    # per-tile fused MXU push against [w_eff | w_src]
    fused = jnp.dot(x_tile, slab_ref[...], preferred_element_type=jnp.float32)  # [TM, D+1]
    grad2 = fused[:, :D]                                              # x_tile @ w_eff
    s_src = fused[:, D:D + 1]                                         # x_tile @ w_src  [TM, 1]

    # dst score for all nodes: (w_dst . x_j) -> [1, N]  (trans-B, no transpose copy)
    s_dst = jax.lax.dot_general(w_dst, x_full, (((1,), (1,)), ((), ())),
                                preferred_element_type=jnp.float32)

    # edge_ode_func_net: edge_value[i,j] = adj[i,j] * sigmoid(s_src_i + s_dst_j + b_e)
    edge_value = adj_ref[...] * jax.nn.sigmoid(s_src + s_dst + b_e)   # [TM, N]

    # node_ode_func_net: grad_node = tanh(E @ (x @ w_n) + b_n)
    grad_node = jnp.tanh(
        jnp.dot(edge_value, msg, preferred_element_type=jnp.float32) + b_n)

    # dropout: identity in eval mode
    # fused epilogue: gate * grad_node - x + grad2 - x   (gate precomputed)
    out_ref[...] = gate_ref[...] * grad_node + grad2 - 2.0 * x_tile


def _choose_row_tile(N):
    # Row tile of adj/out. 2 (double-buffer) x TM x N x 4B of adj stays well under
    # the 16/32 MiB scoped-VMEM defaults (v5e / v6e+v7x) up to N ~ 8k at TM=256,
    # and TM is 128-aligned for the v5e MXU. Small graphs run as a single tile.
    if N <= 256:
        return N
    for tm in (256, 128, 64, 32, 16, 8):
        if N % tm == 0:
            return tm
    return N


def make_coupled_ode_step(params, adj, N, D, tm=None):
    """Precompute all parameter-only math once (hoisted out of the ODE time loop)
    and return a jitted step function x -> dx/dt backed by one pallas_call."""
    f32 = jnp.float32
    if tm is None:
        tm = _choose_row_tile(N)
    assert N % tm == 0 and (tm == N or tm % 8 == 0)
    grid_steps = N // tm

    # ---- parameter-only precompute (done ONCE, not per ODE step) ----
    d_c = jnp.clip(params["d"], 0.0, 1.0)
    w_eff = jnp.dot(params["w"] * d_c[None, :], params["w"].T)        # [D, D]
    slab = jnp.concatenate([w_eff, params["w_src"]], axis=1).astype(f32)   # [D, D+1]
    w_n = params["w_n"].astype(f32)                                   # [D, D]
    sp = jnp.stack([params["w_dst_row"].reshape(D),
                    params["b_n"].reshape(D)], axis=0).astype(f32)    # [2, D]
    gate = (0.5 * jax.nn.sigmoid(params["alpha"])).reshape(N, 1).astype(f32)
    b_e = params["b_e"].reshape(1, 1).astype(f32)                     # scalar -> SMEM
    adj_f = adj.astype(f32)                                           # cast once, not per step

    cost = pl.CostEstimate(
        flops=int(2 * N * N * D                       # edge_value @ msg
                  + grid_steps * (2 * N * D * D       # per-tile msg recompute
                                  + 2 * N * D)        # per-tile dst score
                  + 2 * N * D * (D + 1)),             # tile slab push
        transcendentals=int(N * N + N * D),
        bytes_accessed=int(4 * (N * N + 3 * N * D + N
                                + D * D + D * (D + 1) + 2 * D + 1)),
    )

    call = pl.pallas_call(
        coupled_ode_kernel,
        out_shape=jax.ShapeDtypeStruct((N, D), f32),
        grid_spec=pltpu.PrefetchScalarGridSpec(
            num_scalar_prefetch=0,
            grid=(grid_steps,),
            in_specs=[
                pl.BlockSpec((N, D), lambda i: (0, 0)),       # x, full / resident
                pl.BlockSpec((tm, D), lambda i: (i, 0)),      # x, row tile
                pl.BlockSpec((tm, N), lambda i: (i, 0)),      # adj, row tile
                pl.BlockSpec((D, D), lambda i: (0, 0)),       # w_n, resident
                pl.BlockSpec((D, D + 1), lambda i: (0, 0)),   # [w_eff | w_src], resident
                pl.BlockSpec((2, D), lambda i: (0, 0)),       # [w_dst ; b_n], resident
                pl.BlockSpec((tm, 1), lambda i: (i, 0)),      # gate, row tile
                pl.BlockSpec((1, 1), lambda i: (0, 0),
                             memory_space=pltpu.MemorySpace.SMEM),  # b_e scalar
            ],
            out_specs=pl.BlockSpec((tm, D), lambda i: (i, 0)),
        ),
        compiler_params=pltpu.CompilerParams(
            dimension_semantics=("parallel",)),
        cost_estimate=cost,
    )

    @jax.jit
    def step(x):
        xf = x.astype(f32)
        return call(xf, xf, adj_f, w_n, slab, sp, gate, b_e)

    return step


def reference(x, adj, params):
    """Pure-JAX reference mirroring the PyTorch forward (eval mode)."""
    N, D = x.shape
    s_src = x @ params["w_src"]                                       # [N, 1]
    s_dst = params["w_dst_row"] @ x.T                                 # [1, N]
    edge_value = adj * jax.nn.sigmoid(s_src + s_dst + params["b_e"][0])
    msg = x @ params["w_n"]
    grad_node = jnp.tanh(edge_value @ msg + params["b_n"].reshape(1, D))
    d = jnp.clip(params["d"], 0.0, 1.0)
    w = (params["w"] * d[None, :]) @ params["w"].T
    grad2 = x @ w
    alpha = jax.nn.sigmoid(params["alpha"]).reshape(N, 1)
    return alpha / 2.0 * grad_node - x + grad2 - x


if __name__ == "__main__":
    # keep reference matmuls in full f32 so kernel/reference comparison is
    # apples-to-apples with the MXU's f32-accumulated result
    jax.config.update("jax_default_matmul_precision", "highest")

    N, D = 16, 32  # node_size, embedding dim (edge_ode_func_net.input_dim == D)

    key = jax.random.PRNGKey(0)
    k_x, k_src, k_dst, k_n = jax.random.split(key, 4)

    # Input node embeddings [node_size, dim]
    x = jax.random.normal(k_x, (N, D), dtype=jnp.float32)

    # Deterministic edge_index: bidirectional ring graph -> dense adjacency.
    src = jnp.concatenate([jnp.arange(N), (jnp.arange(N) + 1) % N])
    dst = jnp.concatenate([(jnp.arange(N) + 1) % N, jnp.arange(N)])
    edge_index = jnp.stack([src, dst])                                # [2, 2N]
    adj = jnp.zeros((N, N), jnp.float32).at[edge_index[1], edge_index[0]].set(1.0)

    # Parameters (match CoupledODEFunc.__init__ / init_network_weights)
    params = {
        "alpha": 0.8 * jnp.ones((N,), jnp.float32),                   # nn.Parameter(0.8*ones(node_size))
        "w": jnp.eye(D, dtype=jnp.float32),                           # nn.Parameter(eye(input_dim))
        "d": jnp.ones((D,), jnp.float32),                             # nn.Parameter(ones(input_dim))
        # synthetic edge_ode_func_net (linear edge scorer), std=0.1, zero bias
        "w_src": 0.1 * jax.random.normal(k_src, (D, 1), jnp.float32),
        "w_dst_row": 0.1 * jax.random.normal(k_dst, (1, D), jnp.float32),
        "b_e": jnp.zeros((1,), jnp.float32),
        # synthetic node_ode_func_net (message transform), std=0.1, zero bias
        "w_n": 0.1 * jax.random.normal(k_n, (D, D), jnp.float32),
        "b_n": jnp.zeros((D,), jnp.float32),
    }

    # Build once: all parameter-only math + pallas_call live outside the loop.
    ode_step = make_coupled_ode_step(params, adj, N, D)

    # ---- single step: validate against the reference forward ----
    out = jax.block_until_ready(ode_step(x))
    ref = reference(x, adj, params)
    assert out.shape == (N, D) and out.dtype == jnp.float32
    assert not jnp.isnan(out).any()
    assert jnp.allclose(out, ref, atol=1e-4, rtol=1e-4), "kernel/reference mismatch"

    # ---- amortized multi-step Euler rollout under ONE jit (launch overhead
    #      and param slabs shared across ODE steps) ----
    dt, n_steps = 0.01, 4

    @jax.jit
    def rollout(x0):
        def body(xc, _):
            return xc + dt * ode_step(xc), None
        return jax.lax.scan(body, x0, None, length=n_steps)[0]

    x_roll = jax.block_until_ready(rollout(x))
    x_ref = x
    for _ in range(n_steps):
        x_ref = x_ref + dt * reference(x_ref, adj, params)
    assert not jnp.isnan(x_roll).any()
    assert jnp.allclose(x_roll, x_ref, atol=1e-3, rtol=1e-3), "rollout mismatch"

    print("KERNEL_OK")
</pallas_src>

<mosaic_0001>
module attributes {stable_mosaic.version = 11 : i64} {
  func.func @coupled_ode_kernel(%arg0: i32, %arg1: memref<16x32xf32, #tpu.memory_space<vmem>>, %arg2: memref<16x32xf32, #tpu.memory_space<vmem>>, %arg3: memref<16x16xf32, #tpu.memory_space<vmem>>, %arg4: memref<32x32xf32, #tpu.memory_space<vmem>>, %arg5: memref<32x33xf32, #tpu.memory_space<vmem>>, %arg6: memref<2x32xf32, #tpu.memory_space<vmem>>, %arg7: memref<16x1xf32, #tpu.memory_space<vmem>>, %arg8: memref<1x1xf32, #tpu.memory_space<smem>>, %arg9: memref<16x32xf32, #tpu.memory_space<vmem>>) attributes {dimension_semantics = [#tpu.dimension_semantics<parallel>], iteration_bounds = array<i64: 1>, scalar_prefetch = 0 : i64, scratch_operands = 0 : i64, tpu.core_type = #tpu.core_type<tc>, window_params = [{pipeline_mode = #tpu.pipeline_mode<synchronous>, transform_indices = @transform_0, window_bounds = array<i64: 16, 32>}, {transform_indices = @transform_1, window_bounds = array<i64: 16, 32>}, {transform_indices = @transform_2, window_bounds = array<i64: 16, 16>}, {pipeline_mode = #tpu.pipeline_mode<synchronous>, transform_indices = @transform_3, window_bounds = array<i64: 32, 32>}, {pipeline_mode = #tpu.pipeline_mode<synchronous>, transform_indices = @transform_4, window_bounds = array<i64: 32, 33>}, {pipeline_mode = #tpu.pipeline_mode<synchronous>, transform_indices = @transform_5, window_bounds = array<i64: 2, 32>}, {transform_indices = @transform_6, window_bounds = array<i64: 16, 1>}, {transform_indices = @transform_7, window_bounds = array<i64: 1, 1>}, {transform_indices = @transform_8, window_bounds = array<i64: 16, 32>}]} {
    %c0 = arith.constant 0 : index
    %c0_0 = arith.constant 0 : index
    %0 = vector.load %arg1[%c0, %c0_0] : memref<16x32xf32, #tpu.memory_space<vmem>>, vector<16x32xf32>
    %c0_1 = arith.constant 0 : index
    %c0_2 = arith.constant 0 : index
    %1 = vector.load %arg2[%c0_1, %c0_2] : memref<16x32xf32, #tpu.memory_space<vmem>>, vector<16x32xf32>
    %c0_3 = arith.constant 0 : index
    %c0_4 = arith.constant 0 : index
    %2 = vector.load %arg6[%c0_3, %c0_4] : memref<2x32xf32, #tpu.memory_space<vmem>>, vector<1x32xf32>
    %c1 = arith.constant 1 : index
    %c0_5 = arith.constant 0 : index
    %3 = vector.load %arg6[%c1, %c0_5] : memref<2x32xf32, #tpu.memory_space<vmem>>, vector<1x32xf32>
    %c0_6 = arith.constant 0 : index
    %c0_7 = arith.constant 0 : index
    %4 = memref.load %arg8[%c0_6, %c0_7] : memref<1x1xf32, #tpu.memory_space<smem>>
    %c0_8 = arith.constant 0 : index
    %c0_9 = arith.constant 0 : index
    %5 = vector.load %arg4[%c0_8, %c0_9] : memref<32x32xf32, #tpu.memory_space<vmem>>, vector<32x32xf32>
    %cst = arith.constant dense<0.000000e+00> : vector<16x32xf32>
    %6 = tpu.matmul %0, %5, %cst {dimension_numbers = #tpu.dot_dimension_numbers<[1], [0], [0], [1], [0, 0, 1, 1], [], []>, precision = #tpu.contract_precision<fp32>} : vector<16x32xf32>, vector<32x32xf32>, vector<16x32xf32> -> vector<16x32xf32>
    %c0_10 = arith.constant 0 : index
    %c0_11 = arith.constant 0 : index
    %7 = vector.load %arg5[%c0_10, %c0_11] : memref<32x33xf32, #tpu.memory_space<vmem>>, vector<32x33xf32>
    %cst_12 = arith.constant dense<0.000000e+00> : vector<16x33xf32>
    %8 = tpu.matmul %1, %7, %cst_12 {dimension_numbers = #tpu.dot_dimension_numbers<[1], [0], [0], [1], [0, 0, 1, 1], [], []>, precision = #tpu.contract_precision<fp32>} : vector<16x32xf32>, vector<32x33xf32>, vector<16x33xf32> -> vector<16x33xf32>
    %9 = vector.extract_strided_slice %8 {offsets = [0, 0], sizes = [16, 32], strides = [1, 1]} : vector<16x33xf32> to vector<16x32xf32>
    %10 = vector.extract_strided_slice %8 {offsets = [0, 32], sizes = [16, 1], strides = [1, 1]} : vector<16x33xf32> to vector<16x1xf32>
    %cst_13 = arith.constant dense<0.000000e+00> : vector<1x16xf32>
    %11 = tpu.matmul %2, %0, %cst_13 {dimension_numbers = #tpu.dot_dimension_numbers<[1], [1], [0], [0], [0, 0, 1, 0], [], []>, precision = #tpu.contract_precision<fp32>} : vector<1x32xf32>, vector<16x32xf32>, vector<1x16xf32> -> vector<1x16xf32>
    %c0_14 = arith.constant 0 : index
    %c0_15 = arith.constant 0 : index
    %12 = vector.load %arg3[%c0_14, %c0_15] : memref<16x16xf32, #tpu.memory_space<vmem>>, vector<16x16xf32>
    %13 = vector.broadcast %10 : vector<16x1xf32> to vector<16x16xf32>
    %14 = vector.broadcast %11 : vector<1x16xf32> to vector<16x16xf32>
    %15 = arith.addf %13, %14 : vector<16x16xf32>
    %16 = vector.broadcast %4 : f32 to vector<16x16xf32>
    %17 = arith.addf %15, %16 : vector<16x16xf32>
    %18 = arith.negf %17 : vector<16x16xf32>
    %19 = math.exp %18 : vector<16x16xf32>
    %cst_16 = arith.constant 1.000000e+00 : f32
    %20 = vector.broadcast %cst_16 : f32 to vector<16x16xf32>
    %21 = arith.addf %20, %19 : vector<16x16xf32>
    %22 = arith.divf %20, %21 : vector<16x16xf32>
    %23 = arith.mulf %12, %22 : vector<16x16xf32>
    %cst_17 = arith.constant dense<0.000000e+00> : vector<16x32xf32>
    %24 = tpu.matmul %23, %6, %cst_17 {dimension_numbers = #tpu.dot_dimension_numbers<[1], [0], [0], [1], [0, 0, 1, 1], [], []>, precision = #tpu.contract_precision<fp32>} : vector<16x16xf32>, vector<16x32xf32>, vector<16x32xf32> -> vector<16x32xf32>
    %25 = vector.broadcast %3 : vector<1x32xf32> to vector<16x32xf32>
    %26 = arith.addf %24, %25 : vector<16x32xf32>
    %27 = math.tanh %26 : vector<16x32xf32>
    %c0_18 = arith.constant 0 : index
    %c0_19 = arith.constant 0 : index
    %28 = vector.load %arg7[%c0_18, %c0_19] : memref<16x1xf32, #tpu.memory_space<vmem>>, vector<16x1xf32>
    %29 = vector.broadcast %28 : vector<16x1xf32> to vector<16x32xf32>
    %30 = arith.mulf %29, %27 : vector<16x32xf32>
    %31 = arith.addf %30, %9 : vector<16x32xf32>
    %cst_20 = arith.constant 2.000000e+00 : f32
    %32 = vector.broadcast %cst_20 : f32 to vector<16x32xf32>
    %33 = arith.mulf %32, %1 : vector<16x32xf32>
    %34 = arith.subf %31, %33 : vector<16x32xf32>
    %c0_21 = arith.constant 0 : index
    %c0_22 = arith.constant 0 : index
    %35 = vector.load %arg9[%c0_21, %c0_22] : memref<16x32xf32, #tpu.memory_space<vmem>>, vector<16x32xf32>
    tpu.vector_store %arg9[%c0_21, %c0_22], %34 {strides = array<i32>} : memref<16x32xf32, #tpu.memory_space<vmem>>, vector<16x32xf32>,
    return
  }
  func.func @transform_0(%arg0: i32) -> (i32, i32) {
    %c0_i32 = arith.constant 0 : i32
    %c0_i32_0 = arith.constant 0 : i32
    %c0_i32_1 = arith.constant 0 : i32
    return %c0_i32, %c0_i32_0 : i32, i32
  }
  func.func @transform_1(%arg0: i32) -> (i32, i32) {
    %c0_i32 = arith.constant 0 : i32
    %c0_i32_0 = arith.constant 0 : i32
    return %arg0, %c0_i32 : i32, i32
  }
  func.func @transform_2(%arg0: i32) -> (i32, i32) {
    %c0_i32 = arith.constant 0 : i32
    %c0_i32_0 = arith.constant 0 : i32
    return %arg0, %c0_i32 : i32, i32
  }
  func.func @transform_3(%arg0: i32) -> (i32, i32) {
    %c0_i32 = arith.constant 0 : i32
    %c0_i32_0 = arith.constant 0 : i32
    %c0_i32_1 = arith.constant 0 : i32
    return %c0_i32, %c0_i32_0 : i32, i32
  }
  func.func @transform_4(%arg0: i32) -> (i32, i32) {
    %c0_i32 = arith.constant 0 : i32
    %c0_i32_0 = arith.constant 0 : i32
    %c0_i32_1 = arith.constant 0 : i32
    return %c0_i32, %c0_i32_0 : i32, i32
  }
  func.func @transform_5(%arg0: i32) -> (i32, i32) {
    %c0_i32 = arith.constant 0 : i32
    %c0_i32_0 = arith.constant 0 : i32
    %c0_i32_1 = arith.constant 0 : i32
    return %c0_i32, %c0_i32_0 : i32, i32
  }
  func.func @transform_6(%arg0: i32) -> (i32, i32) {
    %c0_i32 = arith.constant 0 : i32
    %c0_i32_0 = arith.constant 0 : i32
    return %arg0, %c0_i32 : i32, i32
  }
  func.func @transform_7(%arg0: i32) -> (i32, i32) {
    %c0_i32 = arith.constant 0 : i32
    %c0_i32_0 = arith.constant 0 : i32
    %c0_i32_1 = arith.constant 0 : i32
    return %c0_i32, %c0_i32_0 : i32, i32
  }
  func.func @transform_8(%arg0: i32) -> (i32, i32) {
    %c0_i32 = arith.constant 0 : i32
    %c0_i32_0 = arith.constant 0 : i32
    return %arg0, %c0_i32 : i32, i32
  }
}

</mosaic_0001>

<bundles_post_ra>
// kernel: step.1
= control target key start
LH: loop header
LB: loop body
LE: loop exit
PB: predicated region body
PF: predicated region fallthrough
CT: control target
= control target key end

     0   :  { %14 = vsyncpa [#allocation4], 0  ;;  %s3216_s0 = inlined_call_operand.vmem [shape: f32[16,32], index: 0, kind: input, shape index: {}, may-alias: {0,1}]   ;;  %s3217_s1 = inlined_call_operand.vmem [shape: f32[16,32], index: 1, kind: input, shape index: {}, may-alias: {0,1}]   ;;  %s3218_s2 = inlined_call_operand.hbm [shape: f32[16,16], index: 2, kind: input, shape index: {}]   ;;  %s3219_s3 = inlined_call_operand.hbm [shape: f32[32,32], index: 3, kind: input, shape index: {}]   ;;  %s3220_s4 = inlined_call_operand.hbm [shape: f32[32,33], index: 4, kind: input, shape index: {}]   ;;  %s3221_s5 = inlined_call_operand.vmem [shape: f32[2,32], index: 5, kind: input, shape index: {}]   ;;  %s3222_s6 = inlined_call_operand.vmem [shape: f32[16,1], index: 6, kind: input, shape index: {}]   ;;  %s3223_s7 = inlined_call_operand.<no memory space> [shape: f32[1,1], index: 7, kind: input, shape index: {}]   ;;  %s3224_s8 = inlined_call_operand.hbm [shape: f32[16,32], index: 8, kind: output, shape index: {}]  }
   0x1   :  { %15 = vsyncpa [#allocation7], 0 }
   0x2   :  { %16 = vsyncpa [#allocation5], 0  ;;  %s2841_s27 = smov [#allocation6]   ;;  %s2842_s29 = smov [#allocation3]  }
   0x3   :  { %s38_s28 = sshll.u32 %s2841_s27, 4  ;;  %s26_s30 = sshll.u32 %s2842_s29, 4  ;;  %s39_s28 = int_to_ptr.vmem [resolvable:$true] %s38_s28  ;;  %s2897_s30 = int_to_ptr.vmem [resolvable:$true] %s26_s30 }
   0x4   :  { %s2747_s11 = scalar_lea.hbm %s3219_s3, 512 }
   0x5   :  { %p2748_p0 = scmp.ne.s32.totalorder %s3219_s3, %s2747_s11  ;;  %p2751_p1 = scmp.lt.u32.totalorder %s2747_s11, %s3219_s3 }
   0x7   :  { %p2753_p2 = pnand %p2751_p1, %p2748_p0 }
   0x9   :  { %2756 = shalt.err (!%p2753_p2)
}
   0xa   :  { %s2757_s16 = scalar_lea.vmem %s39_s28, 512  ;;  %p2762_p4 = scmp.lt.s32.totalorder %s39_s28, %s39_s28 }
   0xb   :  { %p2758_p3 = scmp.ne.s32.totalorder %s39_s28, %s2757_s16  ;;  %p2763_p5 = scmp.lt.s32.totalorder %s2757_s16, %s2757_s16 }
   0xd   :  { %p2764_p6 = por %p2763_p5, %p2762_p4 }
   0xf   :  { %p2765_p7 = pnand %p2764_p6, %p2758_p3 }
  0x11   :  { %2768 = shalt.err (!%p2765_p7)
}
  0x12   :  { %s2843_s17 = smov 128   ;;  %s2844_s18 = smov 8  }
  0x13   :  { %44 = dma.hbm_to_vmem [thread:$0]  %s3219_s3, 512, %s39_s28, [#allocation7], %s2843_s17, %s2843_s17, %s2844_s18  }
  0x14   :  { %s2769_s23 = scalar_lea.hbm %s3218_s2, 256 }
  0x15   :  { %p2770_p8 = scmp.ne.s32.totalorder %s3218_s2, %s2769_s23  ;;  %p2773_p9 = scmp.lt.u32.totalorder %s2769_s23, %s3218_s2 }
  0x17   :  { %p2775_p10 = pnand %p2773_p9, %p2770_p8 }
  0x19   :  { %2778 = shalt.err (!%p2775_p10)
}
  0x1a   :  { %s2779_s29 = scalar_lea.vmem %s2897_s30, 256  ;;  %p2784_p12 = scmp.lt.s32.totalorder %s2897_s30, %s2897_s30 }
  0x1b   :  { %p2780_p11 = scmp.ne.s32.totalorder %s2897_s30, %s2779_s29  ;;  %p2785_p13 = scmp.lt.s32.totalorder %s2779_s29, %s2779_s29 }
  0x1d   :  { %p2786_p0 = por %p2785_p13, %p2784_p12 }
  0x1f   :  { %p2787_p1 = pnand %p2786_p0, %p2780_p11 }
  0x21   :  { %2790 = shalt.err (!%p2787_p1)
}
  0x22   :  { %32 = dma.hbm_to_vmem [thread:$0]  %s3218_s2, 256, %s2897_s30, [#allocation4], %s2843_s17, %s2843_s17, %s2844_s18  }
  0x23   :  { %s2845_s9 = smov [#allocation8]   ;;  %s2791_s13 = scalar_lea.hbm %s3220_s4, 512 }
  0x24   :  { %s50_s10 = sshll.u32 %s2845_s9, 4  ;;  %p2792_p2 = scmp.ne.s32.totalorder %s3220_s4, %s2791_s13  ;;  %s51_s10 = int_to_ptr.vmem [resolvable:$true] %s50_s10 }
  0x25   :  { %p2795_p3 = scmp.lt.u32.totalorder %s2791_s13, %s3220_s4 }
  0x27   :  { %p2797_p4 = pnand %p2795_p3, %p2792_p2 }
  0x29   :  { %2800 = shalt.err (!%p2797_p4)
}
  0x2a   :  { %s2801_s20 = scalar_lea.vmem %s51_s10, 512  ;;  %p2806_p6 = scmp.lt.s32.totalorder %s51_s10, %s51_s10 }
  0x2b   :  { %p2802_p5 = scmp.ne.s32.totalorder %s51_s10, %s2801_s20  ;;  %p2807_p7 = scmp.lt.s32.totalorder %s2801_s20, %s2801_s20 }
  0x2d   :  { %p2808_p8 = por %p2807_p7, %p2806_p6 }
  0x2f   :  { %p2809_p9 = pnand %p2808_p8, %p2802_p5 }
  0x31   :  { %2812 = shalt.err (!%p2809_p9)
}
  0x32   :  { %56 = dma.hbm_to_vmem [thread:$0]  %s3220_s4, 512, %s51_s10, [#allocation7], %s2843_s17, %s2843_s17, %s2844_s18  }
  0x33   :  { %2835 = dma.done.wait [#allocation4], 256  }
  0x34   :  { %2836 = vsyncadd [#allocation4], 4294967040 }
  0x35   :  { %2837 = dma.done.wait [#allocation7], 1024  }
  0x36   :  { %2838 = vsyncadd [#allocation7], 4294966272  ;;  %vm83_vm0 = vcmask 261120   ;;  %v79_v0 = vld [vmem:[#allocation6] sm:$0xff]  ;;  %v80_v1 = vld [vmem:[#allocation6 + $0x8] sm:$0xff]  ;;  %vm2847_vm1 = vmmov 0  }
  0x37   :  { %v81_v2 = vld [vmem:[#allocation6 + $0x10] sm:$0xff]  ;;  %v91_v3 = vand.u32 4294901760, %v79_v0  ;;  %v94_v4 = vand.u32 4294901760, %v80_v1  ;;  %v82_v5 = vld [vmem:[#allocation6 + $0x18] sm:$0xff]  ;;  %v618_v12 = vld [vmem:[#allocation8] sm:$0xff]  ;;  %vm1657_vm2 = vcmask 130048  }
  0x38   :  { %v97_v6 = vand.u32 4294901760, %v81_v2  ;;  %v72_v7 = vld [vmem:[%s3216_s0] sm:$0xff]  ;;  %v73_v8 = vld [vmem:[%s3216_s0 + $0x8] sm:$0xff]  ;;  %v100_v9 = vand.u32 4294901760, %v82_v5  ;;  %v619_v13 = vld [vmem:[#allocation8 + $0x8] sm:$0xff]  ;;  %v629_v21 = vand.u32 4294901760, %v618_v12 }
  0x39   :  { %v85_v10 = vsel %vm83_vm0, %v72_v7, 0  ;;  %v88_v11 = vsel %vm83_vm0, %v73_v8, 0  ;;  %v2957_v14 = vpack.c.bf16 %v94_v4, %v91_v3  ;;  %v2963_v17 = vsub.f32 %v79_v0, %v91_v3  ;;  %v620_v18 = vld [vmem:[#allocation8 + $0x10] sm:$0xff]  ;;  %v621_v27 = vld [vmem:[#allocation8 + $0x18] sm:$0xff]  ;;  %s2851_s12 = smov [#allocation9]  }
  0x3a   :  { %v2959_v15 = vand.u32 4294901760, %v85_v10  ;;  %v2961_v16 = vand.u32 4294901760, %v88_v11  ;;  %v2965_v19 = vpack.c.bf16 %v100_v9, %v97_v6  ;;  %v2967_v20 = vsub.f32 %v80_v1, %v94_v4  ;;  %v2983_v28 = vld [vmem:[%s3217_s1] sm:$0xff]  ;;  %v3018_v45 = vld [vmem:[%s3217_s1 + $0x8] sm:$0xff] }
  0x3b   :  { %v632_v22 = vand.u32 4294901760, %v619_v13  ;;  %2542 = vmatprep.subr.bf16.mxu1 %v2957_v14  ;;  %v182_v25 = vand.u32 4294901760, %v2963_v17  ;;  %v2977_v26 = vsub.f32 %v81_v2, %v97_v6  ;;  %v2989_v31 = vsub.f32 %v82_v5, %v100_v9 }
  0x3c   :  { %v2971_v23 = vsub.f32 %v85_v10, %v2959_v15  ;;  %v2974_v24 = vsub.f32 %v88_v11, %v2961_v16  ;;  %2344 = vmatprep.mubr.f32.mxu0 %v2959_v15  ;;  %2544 = vmatpush3.bf16.msra.mxu1 %v2957_v14  ;;  %v189_v29 = vand.u32 4294901760, %v2967_v20  ;;  %v635_v32 = vand.u32 4294901760, %v620_v18 }
  0x3d   :  { %v2987_v30 = vpack.c.bf16 %v632_v22, %v629_v21  ;;  %2546 = vmatprep.subr.bf16.mxu1 %v2965_v19  ;;  %v183_v35 = vsub.f32 %v2963_v17, %v182_v25  ;;  %v196_v36 = vand.u32 4294901760, %v2977_v26  ;;  %v203_v38 = vand.u32 4294901760, %v2989_v31 }
  0x3e   :  { %v2993_v33 = vand.u32 4294901760, %v2971_v23  ;;  %v2996_v34 = vand.u32 4294901760, %v2974_v24  ;;  %v190_v37 = vsub.f32 %v2967_v20, %v189_v29  ;;  %v638_v39 = vand.u32 4294901760, %v621_v27 }
  0x3f   :  { %v623_v40 = vsel %vm83_vm0, %v2983_v28, 0  ;;  %v184_v43 = vand.u32 4294901760, %v183_v35  ;;  %v197_v44 = vsub.f32 %v2977_v26, %v196_v36  ;;  %v204_v47 = vsub.f32 %v2989_v31, %v203_v38 }
  0x40   :  { %v162_v41 = vsub.f32 %v2971_v23, %v2993_v33  ;;  %v172_v42 = vsub.f32 %v2974_v24, %v2996_v34  ;;  %2548 = vmatpush3.bf16.msra.mxu1 %v2965_v19  ;;  %v191_v46 = vand.u32 4294901760, %v190_v37  ;;  %v3024_v48 = vand.u32 4294901760, %v623_v40 }
  0x41   :  { %2590 = vmatprep.subr.bf16.mxu1 %v2987_v30  ;;  %v198_v51 = vand.u32 4294901760, %v197_v44  ;;  %v3031_v52 = vpack.c.bf16 %v638_v39, %v635_v32  ;;  %v205_v54 = vand.u32 4294901760, %v204_v47  ;;  %v626_v56 = vsel %vm83_vm0, %v3018_v45, 0 }
  0x42   :  { %v3026_v49 = vand.u32 4294901760, %v162_v41  ;;  %v3028_v50 = vand.u32 4294901760, %v172_v42  ;;  %v2549_v53 = vpack.c.bf16 %v191_v46, %v184_v43  ;;  %v3034_v55 = vsub.f32 %v623_v40, %v3024_v48 }
  0x43   :  { %v3039_v57 = vand.u32 4294901760, %v626_v56  ;;  %v3041_v58 = vsub.f32 %v618_v12, %v629_v21  ;;  %v3043_v59 = vsub.f32 %v619_v13, %v632_v22  ;;  %v2553_v60 = vpack.c.bf16 %v205_v54, %v198_v51 }
  0x44   :  { %2333 = vmatprep.mubr.f32.mxu1 %v3026_v49  ;;  %2550 = vmatprep.subr.bf16.mxu0 %v2549_v53  ;;  %v699_v61 = vand.u32 4294901760, %v3034_v55  ;;  %v3047_v62 = vsub.f32 %v620_v18, %v635_v32  ;;  %v3055_v2 = vsub.f32 %v621_v27, %v638_v39  ;;  %v2557_v4 = vpack.c.bf16 %v2967_v20, %v2963_v17  ;;  %v76_v20 = vld [vmem:[%s3221_s5] sm:$0x1] }
  0x45   :  { %2334 = vmatmul.mubr.f32.vlgmr.msra.gmra.mrb[0].mxu1 %v3028_v50  ;;  %2552 = vmatpush3.bf16.msra.mxu0 %v2549_v53  ;;  %v3051_v63 = vsub.f32 %v626_v56, %v3039_v57  ;;  %v720_v0 = vand.u32 4294901760, %v3041_v58  ;;  %v727_v1 = vand.u32 4294901760, %v3043_v59  ;;  %v2561_v35 = vpack.c.bf16 %v2989_v31, %v2977_v26 }
  0x46   :  { %2592 = vmatpush3.bf16.msra.mxu1 %v2987_v30  ;;  %2554 = vmatprep.subr.bf16.mxu0 %v2553_v60  ;;  %v700_v3 = vsub.f32 %v3034_v55, %v699_v61  ;;  %v734_v5 = vand.u32 4294901760, %v3047_v62  ;;  %v741_v9 = vand.u32 4294901760, %v3055_v2  ;;  %v2644_v39 = vpack.c.bf16 %v2974_v24, %v2971_v23 }
  0x47   :  { %2594 = vmatprep.subr.bf16.mxu1 %v3031_v52  ;;  %v709_v6 = vand.u32 4294901760, %v3051_v63  ;;  %v721_v7 = vsub.f32 %v3041_v58, %v720_v0  ;;  %v728_v8 = vsub.f32 %v3043_v59, %v727_v1  ;;  %v2650_v40 = vpack.c.bf16 %v2996_v34, %v2993_v33 }
  0x48   :  { %v701_v10 = vand.u32 4294901760, %v700_v3  ;;  %v735_v11 = vsub.f32 %v3047_v62, %v734_v5  ;;  %v742_v21 = vsub.f32 %v3055_v2, %v741_v9  ;;  %v2605_v42 = vpack.c.bf16 %v3043_v59, %v3041_v58 }
  0x49   :  { %2556 = vmatpush3.bf16.msra.mxu0 %v2553_v60  ;;  %v710_v12 = vsub.f32 %v3051_v63, %v709_v6  ;;  %v722_v13 = vand.u32 4294901760, %v721_v7  ;;  %v729_v18 = vand.u32 4294901760, %v728_v8  ;;  %v2609_v43 = vpack.c.bf16 %v3055_v2, %v3047_v62 }
  0x4a   :  { %2596 = vmatpush3.bf16.msra.mxu1 %v3031_v52  ;;  %2399 = vmatprep.mubr.f32.mxu1 %v701_v10  ;;  %v736_v22 = vand.u32 4294901760, %v735_v11  ;;  %v743_v37 = vand.u32 4294901760, %v742_v21  ;;  %v2573_v44 = vpack.c.bf16 %v189_v29, %v182_v25  ;;  %v2577_v46 = vpack.c.bf16 %v203_v38, %v196_v36 }
  0x4b   :  { %2558 = vmatprep.subr.bf16.mxu0 %v2557_v4  ;;  %v711_v27 = vand.u32 4294901760, %v710_v12  ;;  %v2597_v32 = vpack.c.bf16 %v729_v18, %v722_v13  ;;  %v2621_v17 = vpack.c.bf16 %v727_v1, %v720_v0  ;;  %v2625_v25 = vpack.c.bf16 %v741_v9, %v734_v5 }
  0x4c   :  { %2345 = vmatmul.mubr.f32.vlgmr.msra.gmra.mrb[0].mxu0 %v2961_v16  ;;  %v2601_v41 = vpack.c.bf16 %v743_v37, %v736_v22  ;;  %v1157_v26 = vsel %vm83_vm0, %v76_v20, 0  ;;  %v2846_v36 = vmov 0.0|0.0   ;;  %v2848_v38 = vmov 0.0  }
  0x4d   :  { %2400 = vmatmul.mubr.f32.vlgmr.msra.gmra.mrb[2].mxu1 %v711_v27  ;;  %2598 = vmatprep.subr.bf16.mxu1 %v2597_v32  ;;  %v1226_v29 = vand.u32 4294901760, %v1157_v26  ;;  %v2850_v5 = vmov 0   ;;  %v1630_v7 = vlaneseq  ;;  %v1636_v11 = vstv %s3223_s7 }
  0x4e   :  { %2560 = vmatpush3.bf16.msra.mxu0 %v2557_v4  ;;  %2600 = vmatpush3.bf16.msra.mxu1 %v2597_v32  ;;  %v2168_v4 = vld [vmem:[%s3222_s6] sm:$0xff] }
  0x4f   :  { %2562 = vmatprep.subr.bf16.mxu0 %v2561_v35  ;;  %2602 = vmatprep.subr.bf16.mxu1 %v2601_v41  ;;  %v1227_v31 = vsub.f32 %v1157_v26, %v1226_v29  ;;  %v1631_v8 = vshrl.u32 %v1630_v7, 7 }
  0x50   :  { %2355 = vmatprep.mubr.f32.mxu0 %v2971_v23  ;;  %2410 = vmatprep.mubr.f32.mxu1 %v3024_v48 }
  0x51   :  { %2733 = vset.pattern.permute.xlu1 %v2850_v5  ;;  %v1632_v9 = vsub.s32 0, %v1631_v8 }
  0x52   :  { %2564 = vmatpush3.bf16.msra.mxu0 %v2561_v35  ;;  %2604 = vmatpush3.bf16.msra.mxu1 %v2601_v41 }
  0x53   :  { %2566 = vmatprep.subr.bf16.mxu0 %v2957_v14  ;;  %2606 = vmatprep.subr.bf16.mxu1 %v2605_v42 }
  0x54   :  { %2172 = vperm.xlu1 %2733, %v2168_v4  }
  0x55   :  { %2356 = vmatmul.mubr.f32.vlgmr.msra.gmra.mrb[0].mxu0 %v2974_v24  ;;  %2411 = vmatmul.mubr.f32.vlgmr.msra.gmra.mrb[2].mxu1 %v3039_v57 }
  0x56   :  { %2568 = vmatpush3.bf16.msra.mxu0 %v2957_v14  ;;  %2608 = vmatpush3.bf16.msra.mxu1 %v2605_v42  ;;  %v1618_v42 = vld [vmem:[#allocation3] sm:$0xff] }
  0x57   :  { %2570 = vmatprep.subr.bf16.mxu0 %v2965_v19  ;;  %2610 = vmatprep.subr.bf16.mxu1 %v2609_v43 }
  0x58   :  { %2366 = vmatprep.mubr.f32.mxu0 %v2993_v33  ;;  %2421 = vmatprep.mubr.f32.mxu1 %v3034_v55 }
  0x5a   :  { %2572 = vmatpush3.bf16.msra.mxu0 %v2965_v19  ;;  %2612 = vmatpush3.bf16.msra.mxu1 %v2609_v43 }
  0x5b   :  { %2574 = vmatprep.subr.bf16.mxu0 %v2573_v44  ;;  %2614 = vmatprep.subr.bf16.mxu1 %v2987_v30 }
  0x5d   :  { %2367 = vmatmul.mubr.f32.vlgmr.msra.gmra.mrb[0].mxu0 %v2996_v34  ;;  %2422 = vmatmul.mubr.f32.vlgmr.msra.gmra.mrb[2].mxu1 %v3051_v63 }
  0x5e   :  { %2576 = vmatpush3.bf16.msra.mxu0 %v2573_v44  ;;  %2616 = vmatpush3.bf16.msra.mxu1 %v2987_v30 }
  0x5f   :  { %2578 = vmatprep.subr.bf16.mxu0 %v2577_v46  ;;  %2618 = vmatprep.subr.bf16.mxu1 %v3031_v52 }
  0x60   :  { %2377 = vmatprep.mubr.f32.mxu0 %v2959_v15  ;;  %2432 = vmatprep.mubr.f32.mxu1 %v699_v61 }
  0x62   :  { %2580 = vmatpush3.bf16.msra.mxu0 %v2577_v46  ;;  %2620 = vmatpush3.bf16.msra.mxu1 %v3031_v52  ;;  %v1619_v46 = vld [vmem:[#allocation3 + $0x8] sm:$0xff] }
  0x63   :  { %2582 = vmatprep.subr.bf16.mxu0 %v2957_v14  ;;  %2622 = vmatprep.subr.bf16.mxu1 %v2621_v17 }
  0x65   :  { %2378 = vmatmul.mubr.f32.vlgmr.msra.gmra.mrb[0].mxu0 %v2961_v16  ;;  %2433 = vmatmul.mubr.f32.vlgmr.msra.gmra.mrb[2].mxu1 %v709_v6  ;;  %v2169_v6 = vld [vmem:[%s3222_s6 + $0x8] sm:$0xff] }
  0x66   :  { %2584 = vmatpush3.bf16.msra.mxu0 %v2957_v14  ;;  %2624 = vmatpush3.bf16.msra.mxu1 %v2621_v17  ;;  %v1228_v14 = vand.u32 4294901760, %v1227_v31 }
  0x67   :  { %2586 = vmatprep.subr.bf16.mxu0 %v2965_v19  ;;  %2626 = vmatprep.subr.bf16.mxu1 %v2625_v25 }
  0x68   :  { %2388 = vmatprep.mubr.f32.mxu0 %v2959_v15  ;;  %2443 = vmatprep.mubr.f32.mxu1 %v3024_v48  ;;  %v1229_v47 = vsub.f32 %v1227_v31, %v1228_v14 }
  0x69   :  { %2177 = vperm.xlu1 %2733, %v2169_v6  }
  0x6a   :  { %2588 = vmatpush3.bf16.msra.mxu0 %v2965_v19  ;;  %2628 = vmatpush3.bf16.msra.mxu1 %v2625_v25  ;;  %v2638_v19 = vpack.c.bf16 %v2961_v16, %v2959_v15  ;;  %v2849_v15 = vmov 32  }
  0x6b   :  { %2630 = vmatprep.subr.bf16.mxu1 %v2987_v30  ;;  %2637 = vmatprep.subr.bf16.mxu0 %v2846_v36 }
  0x6c   :  { %2732 = vset.pattern.permute.xlu0 %v2849_v15 }
  0x6d   :  { %2389 = vmatmul.mubr.f32.vlgmr.msra.gmra.mrb[0].mxu0 %v2961_v16  ;;  %2444 = vmatmul.mubr.f32.vlgmr.msra.gmra.mrb[2].mxu1 %v3039_v57 }
  0x6e   :  { %2632 = vmatpush3.bf16.msra.mxu1 %v2987_v30  ;;  %2454 = vmatprep.mubr.f32.mxu1 %v3024_v48  ;;  %v1230_v30 = vand.u32 4294901760, %v1229_v47  ;;  %v2641_v48 = vpack.c.bf16 %v3028_v50, %v3026_v49 }
  0x6f   :  { %2634 = vmatprep.subr.bf16.mxu1 %v3031_v52  ;;  %2461 = vmatprep.mubr.msk.f32.mxu0 %vm2847_vm1, %v2848_v38 }
  0x72   :  { %2636 = vmatpush3.bf16.msra.mxu1 %v3031_v52 }
  0x73   :  { %2639 = vmatpush3.bf16.xpose.msra.mxu0 %v2638_v19 }
  0x74   :  { %2640 = vmatprep.subr.bf16.mxu0 %v2846_v36 }
  0x75   :  { %2455 = vmatmul.mubr.f32.vlgmr.msra.gmra.mrb[2].mxu1 %v3039_v57 }
  0x7a   :  { %2462 = vmatmul.mubr.f32.vlgmr.msra.gmra.mrb[2].mxu0 %v1230_v30 }
  0x7b   :  { %2642 = vmatpush3.bf16.xpose.msra.mxu0 %v2641_v48  ;;  %2468 = vmatprep.mubr.msk.f32.mxu0 %vm2847_vm1, %v2848_v38 }
  0x7c   :  { %2643 = vmatprep.subr.bf16.mxu0 %v2846_v36 }
  0x82   :  { %2469 = vmatmul.mubr.f32.vlgmr.msra.gmra.mrb[2].mxu0 %v1226_v29 }
  0x83   :  { %2645 = vmatpush3.bf16.xpose.msra.mxu0 %v2644_v39  ;;  %2475 = vmatprep.mubr.msk.f32.mxu0 %vm2847_vm1, %v2848_v38 }
  0x84   :  { %2646 = vmatprep.subr.bf16.mxu0 %v2846_v36 }
  0x8a   :  { %2476 = vmatmul.mubr.f32.vlgmr.msra.gmra.mrb[2].mxu0 %v1227_v31 }
  0x8b   :  { %2648 = vmatpush3.bf16.xpose.msra.mxu0 %v2638_v19  ;;  %2482 = vmatprep.mubr.msk.f32.mxu0 %vm2847_vm1, %v2848_v38 }
  0x8c   :  { %2649 = vmatprep.subr.bf16.mxu0 %v2846_v36 }
  0x92   :  { %2483 = vmatmul.mubr.f32.vlgmr.msra.gmra.mrb[2].mxu0 %v1228_v14 }
  0x93   :  { %2651 = vmatpush3.bf16.xpose.msra.mxu0 %v2650_v40  ;;  %2489 = vmatprep.mubr.msk.f32.mxu0 %vm2847_vm1, %v2848_v38 }
  0x94   :  { %2652 = vmatprep.subr.bf16.mxu0 %v2846_v36 }
  0x9a   :  { %2490 = vmatmul.mubr.f32.vlgmr.msra.gmra.mrb[2].mxu0 %v1226_v29 }
  0x9b   :  { %2654 = vmatpush3.bf16.xpose.msra.mxu0 %v2638_v19  ;;  %2496 = vmatprep.mubr.msk.f32.mxu0 %vm2847_vm1, %v2848_v38 }
  0xa2   :  { %2497 = vmatmul.mubr.f32.vlgmr.msra.gmra.mrb[2].mxu0 %v1226_v29 }
 0x118   :  { %v2335_v16 = vpop.f32.mrb[0].mxu1 }
 0x119   :  { %v165_v23 = vpop.f32.mrb[1].mxu1 }
 0x140   :  { %v2390_v24 = vpop.f32.mrb[0].mxu0 }
 0x141   :  { %v2679_v49 = vadd.f32 %v2390_v24, %v2335_v16  ;;  %v608_v50 = vpop.f32.mrb[1].mxu0  ;;  %v2210_v16 = vld [vmem:[%s3221_s5 + $0x1] ss:$0 sm:$0xff]  ;;  %s2195_s5 = sshll.u32 %s2851_s12, 4  ;;  %s2196_s5 = int_to_ptr.vmem [resolvable:$true] %s2195_s5 }
 0x142   :  { %v2680_v51 = vadd.f32 %v608_v50, %v165_v23  ;;  %s2813_s13 = scalar_lea.vmem %s2196_s5, 256  ;;  %p2818_p11 = scmp.lt.s32.totalorder %s2196_s5, %s2196_s5 }
 0x143   :  { %v1668_v52 = vand.u32 4294901760, %v2679_v49  ;;  %p2814_p10 = scmp.ne.s32.totalorder %s2196_s5, %s2813_s13  ;;  %p2819_p12 = scmp.lt.s32.totalorder %s2813_s13, %s2813_s13 }
 0x144   :  { %v1665_v53 = vand.u32 4294901760, %v2680_v51 }
 0x145   :  { %v1760_v33 = vsub.f32 %v2679_v49, %v1668_v52  ;;  %p2820_p13 = por %p2819_p12, %p2818_p11 }
 0x146   :  { %v3161_v34 = vpack.c.bf16 %v1668_v52, %v1665_v53  ;;  %v1753_v54 = vsub.f32 %v2680_v51, %v1665_v53  ;;  %v2173_v51 = vpop.permute.xlu1 %2172 }
 0x147   :  { %v1761_v55 = vand.u32 4294901760, %v1760_v33  ;;  %p2821_p0 = pnand %p2820_p13, %p2814_p10 }
 0x148   :  { %v1754_v56 = vand.u32 4294901760, %v1753_v54  ;;  %v3163_v57 = vpop.f32.mrb[2].mxu1  ;;  %2656 = vmatprep.subr.bf16.mxu1 %v3161_v34  ;;  %v3166_v58 = vpack.c.bf16 %v1760_v33, %v1753_v54 }
 0x149   :  { %v3168_v59 = vpop.f32.mrb[3].mxu1  ;;  %2658 = vmatpush3.bf16.msra.mxu1 %v3161_v34  ;;  %v1762_v60 = vsub.f32 %v1760_v33, %v1761_v55 }
 0x14a   :  { %1622 = vperm.xlu0 %2732, %v3168_v59   ;;  %v1755_v61 = vsub.f32 %v1753_v54, %v1754_v56  ;;  %v3172_v62 = vpack.c.bf16 %v1761_v55, %v1754_v56  ;;  %v2178_v53 = vpop.permute.xlu1 %2177  ;;  %v2185_v55 = vmul.f32 2.0, %v3018_v45  ;;  %v2184_v56 = vmul.f32 2.0, %v2983_v28 }
 0x14b   :  { %v1763_v63 = vand.u32 4294901760, %v1762_v60 }
 0x14c   :  { %v1756_v0 = vand.u32 4294901760, %v1755_v61 }
 0x14e   :  { %1627 = vperm.xlu0 %2732, %v3163_v57   ;;  %v2659_v1 = vpack.c.bf16 %v1763_v63, %v1756_v0 }
 0x150   :  { %2660 = vmatprep.subr.bf16.mxu1 %v2659_v1 }
 0x152   :  { %2734 = vset.pattern.permute.xlu0 %v2850_v5 }
 0x175   :  { %v1614_v2 = vpop.f32.mrb[2].mxu0 }
 0x176   :  { %v2498_v3 = vpop.f32.mrb[3].mxu0  ;;  %v1633_v10 = vrot.slane %v1614_v2, %v1632_v9 }
 0x1c9   :  { %v1623_v12 = vpop.permute.xlu0 %1622 }
 0x1ca   :  { %v1634_v13 = vadd.f32 %v1633_v10, %v1623_v12 }
 0x1cc   :  { %v1637_v18 = vadd.f32 %v1636_v11, %v1634_v13 }
 0x1cd   :  { %v1628_v21 = vpop.permute.xlu0 %1627 }
 0x1ce   :  { %v2208_v22 = vmul.f32 -1.442695, %v1637_v18  ;;  %v1635_v27 = vadd.f32 %v1633_v10, %v1628_v21 }
 0x1d0   :  { %2735 = vpow2.f32 %v2208_v22  ;;  %v1638_v32 = vadd.f32 %v1636_v11, %v1635_v27 }
 0x1d2   :  { %v2209_v35 = vmul.f32 -1.442695, %v1638_v32 }
 0x1d4   :  { %2737 = vpow2.f32 %v2209_v35 }
 0x1da   :  { %v2736_v37 = vpop.eup %2735 }
 0x1db   :  { %v1645_v39 = vadd.f32 1.0, %v2736_v37 }
 0x1dd   :  { %2739 = vrcp.f32 %v1645_v39 }
 0x1de   :  { %v2738_v40 = vpop.eup %2737 }
 0x1df   :  { %v1646_v41 = vadd.f32 1.0, %v2738_v40 }
 0x1e1   :  { %2741 = vrcp.f32 %v1646_v41 }
 0x1e7   :  { %v2740_v43 = vpop.eup %2739 }
 0x1e8   :  { %v1651_v44 = vmul.f32 %v2740_v43, %v1618_v42 }
 0x1ea   :  { %v1659_v17 = vsel %vm1657_vm2, %v1651_v44, 0 }
 0x1eb   :  { %v2742_v20 = vpop.eup %2741  ;;  %v1731_v25 = vand.u32 4294901760, %v1659_v17 }
 0x1ec   :  { %v1652_v26 = vmul.f32 %v2742_v20, %v1619_v46 }
 0x1ed   :  { %v1732_v29 = vsub.f32 %v1659_v17, %v1731_v25 }
 0x1ee   :  { %v1662_v31 = vsel %vm1657_vm2, %v1652_v26, 0 }
 0x1ef   :  { %v1733_v36 = vand.u32 4294901760, %v1732_v29  ;;  %v1741_v14 = vand.u32 4294901760, %v1662_v31 }
 0x1f1   :  { %v1734_v19 = vsub.f32 %v1732_v29, %v1733_v36  ;;  %v1742_v38 = vsub.f32 %v1662_v31, %v1741_v14 }
 0x1f3   :  { %v1735_v47 = vand.u32 4294901760, %v1734_v19  ;;  %v1743_v30 = vand.u32 4294901760, %v1742_v38 }
 0x1f5   :  { %2503 = vmatprep.mubr.f32.mxu1 %v1735_v47  ;;  %v1744_v48 = vsub.f32 %v1742_v38, %v1743_v30 }
 0x1f7   :  { %v1745_v15 = vand.u32 4294901760, %v1744_v48 }
 0x1f9   :  { %2504 = vmatmul.mubr.f32.vlgmr.msra.gmra.mrb[4].mxu1 %v1745_v15 }
 0x1fa   :  { %2662 = vmatpush3.bf16.msra.mxu1 %v2659_v1  ;;  %2510 = vmatprep.mubr.f32.mxu1 %v1731_v25 }
 0x1fb   :  { %2664 = vmatprep.subr.bf16.mxu1 %v3166_v58 }
 0x201   :  { %2511 = vmatmul.mubr.f32.vlgmr.msra.gmra.mrb[4].mxu1 %v1741_v14 }
 0x202   :  { %2666 = vmatpush3.bf16.msra.mxu1 %v3166_v58  ;;  %2517 = vmatprep.mubr.f32.mxu1 %v1732_v29 }
 0x203   :  { %2668 = vmatprep.subr.bf16.mxu1 %v3161_v34 }
 0x209   :  { %2518 = vmatmul.mubr.f32.vlgmr.msra.gmra.mrb[4].mxu1 %v1742_v38 }
 0x20a   :  { %2670 = vmatpush3.bf16.msra.mxu1 %v3161_v34  ;;  %2524 = vmatprep.mubr.f32.mxu1 %v1733_v36 }
 0x20b   :  { %2672 = vmatprep.subr.bf16.mxu1 %v3172_v62 }
 0x211   :  { %2525 = vmatmul.mubr.f32.vlgmr.msra.gmra.mrb[4].mxu1 %v1743_v30 }
 0x212   :  { %2674 = vmatpush3.bf16.msra.mxu1 %v3172_v62  ;;  %2531 = vmatprep.mubr.f32.mxu1 %v1731_v25 }
 0x213   :  { %2676 = vmatprep.subr.bf16.mxu1 %v3161_v34 }
 0x219   :  { %2532 = vmatmul.mubr.f32.vlgmr.msra.gmra.mrb[4].mxu1 %v1741_v14 }
 0x21a   :  { %2678 = vmatpush3.bf16.msra.mxu1 %v3161_v34  ;;  %2538 = vmatprep.mubr.f32.mxu1 %v1731_v25 }
 0x221   :  { %2539 = vmatmul.mubr.f32.vlgmr.msra.gmra.mrb[4].mxu1 %v1741_v14 }
 0x2f4   :  { %v2540_v23 = vpop.f32.mrb[4].mxu1 }
 0x2f5   :  { %v2681_v24 = vadd.f32 %v2540_v23, %v2210_v16  ;;  %v2156_v49 = vpop.f32.mrb[5].mxu1 }
 0x2f6   :  { %v2682_v50 = vadd.f32 %v2210_v16, %v2156_v49 }
 0x2f7   :  { %2743 = vtanh.f32 %v2681_v24 }
 0x2f8   :  { %2745 = vtanh.f32 %v2682_v50 }
 0x301   :  { %v2744_v52 = vpop.eup %2743 }
 0x302   :  { %v2746_v33 = vpop.eup %2745  ;;  %v2181_v54 = vmul.f32 %v2744_v52, %v2178_v53 }
 0x303   :  { %v2180_v34 = vmul.f32 %v2746_v33, %v2173_v51 }
 0x304   :  { %v2183_v58 = vadd.f32 %v3163_v57, %v2181_v54 }
 0x305   :  { %v2182_v60 = vadd.f32 %v2180_v34, %v3168_v59 }
 0x306   :  { %v2187_v61 = vsub.f32 %v2183_v58, %v2185_v55 }
 0x307   :  { %v2186_v62 = vsub.f32 %v2182_v60, %v2184_v56 }
 0x308   :  { %2189 = vst.msk [vmem:[#allocation9 + $0x8] sm:$0xff] %vm83_vm0, %v2187_v61 }
 0x309   :  { %2188 = vst.msk [vmem:[#allocation9] sm:$0xff] %vm83_vm0, %v2186_v62 }
 0x30a   :  { %2824 = shalt.err (!%p2821_p0)
}
 0x30b   :  { %s2825_s16 = scalar_lea.hbm %s3224_s8, 256 }
 0x30c   :  { %p2826_p1 = scmp.ne.s32.totalorder %s3224_s8, %s2825_s16  ;;  %p2829_p2 = scmp.lt.u32.totalorder %s2825_s16, %s3224_s8 }
 0x30e   :  { %p2831_p3 = pnand %p2829_p2, %p2826_p1 }
 0x310   :  { %2834 = shalt.err (!%p2831_p3)
}
 0x311   :  { %2201 = dma.vmem_to_hbm [thread:$0]  %s2196_s5, 256, %s3224_s8, [#allocation5], %s2843_s17, %s2843_s17, %s2844_s18  }
 0x312   :  { %2839 = dma.done.wait [#allocation5], 256  }
 0x313   :  { %2840 = vsyncadd [#allocation5], 4294967040 }
 0x314   :  { %2205 = vsyncpa [#allocation4], 1 }
 0x315   :  { %2206 = vsyncpa [#allocation7], 1 }
 0x316   :  { %2207 = vsyncpa [#allocation5], 1 }

</bundles_post_ra>
